<compile_context>
chip_gen: v7x
topology: tpu7x:2x2x1
jax: 0.10.0
libtpu: 0.0.40
codegen_flags: <defaults>
</compile_context>

<pallas_src>
import jax
import jax.numpy as jnp
from jax import lax
from jax.experimental import pallas as pl
from jax.experimental.pallas import tpu as pltpu


def head_kernel(x_ref, w_ref, o_ref):
    # x_ref: (Bt, T, C) batch tile; w_ref: (C, 3H) fused QKV weight
    # o_ref: (Bt*T, H) output slab (batch folded into rows)
    Bt, T, C = x_ref.shape
    H3 = w_ref.shape[1]
    H = H3 // 3

    # --- fused QKV projection on the MXU (bf16 inputs, f32 accumulate) ---
    x2d = x_ref[...].reshape(Bt * T, C)                       # cheap: leading-dim merge
    qkv = jnp.dot(
        x2d.astype(jnp.bfloat16),
        w_ref[...].astype(jnp.bfloat16),
        preferred_element_type=jnp.float32,
    )                                                         # (Bt*T, 3H) f32
    qkv = qkv.reshape(Bt, T, H3)
    q = qkv[:, :, 0 * H:1 * H]
    k = qkv[:, :, 1 * H:2 * H]
    v = qkv[:, :, 2 * H:3 * H]

    # --- scores: contract the shared head dim directly (no k transpose) ---
    s = jnp.einsum("bqh,bkh->bqk", q, k,
                   preferred_element_type=jnp.float32)        # (Bt, T, T)
    s = s * (C ** -0.5)   # NOTE: scale by n_embd**-0.5, exactly as the module

    # causal (lower-triangular) mask
    row = lax.broadcasted_iota(jnp.int32, (Bt, T, T), 1)
    col = lax.broadcasted_iota(jnp.int32, (Bt, T, T), 2)
    s = jnp.where(col <= row, s, -jnp.inf)

    # --- softmax over keys, f32 throughout ---
    s_max = jnp.max(s, axis=-1, keepdims=True)
    p = jnp.exp(s - s_max)
    denom = jnp.sum(p, axis=-1, keepdims=True)
    p = p * pl.reciprocal(denom, approx=True)                 # EUP vrcp

    # --- weighted sum of values (bf16 on MXU, f32 accumulate) ---
    out = jnp.einsum("bqk,bkh->bqh",
                     p.astype(jnp.bfloat16), v.astype(jnp.bfloat16),
                     preferred_element_type=jnp.float32)      # (Bt, T, H)

    o_ref[...] = out.reshape(Bt * T, H).astype(o_ref.dtype)


def head_forward(x, wq, wk, wv, *, batch_tile=None):
    """Single self-attention head. x: (B, T, C); wq/wk/wv: (C, H)."""
    B, T, C = x.shape
    H = wq.shape[1]

    # Fuse projections -> one (C, 3H) weight, one MXU pass, one DMA stream.
    w_qkv = jnp.concatenate([wq, wk, wv], axis=1)             # (C, 3H)

    if batch_tile is None:
        batch_tile = B if B <= 8 else 8
    assert B % batch_tile == 0, "B must be divisible by batch_tile"
    Bt = batch_tile
    grid = (B // Bt,)

    # NOTE: the weight index_map is constant so it is DMA'd once; its second
    # pipeline buffer costs only C*3H*4 bytes here (negligible). With large C,
    # mark it pipeline_mode=pl.Buffered(1) or keep it resident in scratch.
    out_flat = pl.pallas_call(
        head_kernel,
        out_shape=jax.ShapeDtypeStruct((B * T, H), x.dtype),
        grid_spec=pltpu.PrefetchScalarGridSpec(
            num_scalar_prefetch=0,
            grid=grid,
            in_specs=[
                pl.BlockSpec((Bt, T, C), lambda b: (b, 0, 0)),
                pl.BlockSpec((C, 3 * H), lambda b: (0, 0)),
            ],
            out_specs=pl.BlockSpec((Bt * T, H), lambda b: (b, 0)),
        ),
        compiler_params=pltpu.CompilerParams(
            dimension_semantics=("parallel",),
        ),
    )(x, w_qkv)
    return out_flat.reshape(B, T, H)


def reference_head(x, wq, wk, wv):
    """Pure-JAX f32 reference mirroring the PyTorch forward (eval mode)."""
    B, T, C = x.shape
    q = x @ wq
    k = x @ wk
    v = x @ wv
    w = jnp.einsum("bth,bsh->bts", q, k) * (C ** -0.5)
    mask = jnp.tril(jnp.ones((T, T), dtype=bool))
    w = jnp.where(mask, w, -jnp.inf)
    w = jax.nn.softmax(w, axis=-1)
    return jnp.einsum("bts,bsh->bth", w, v)


if __name__ == "__main__":
    # shapes consistent with Head(n_embd=32, block_size=8, head_size=16, dropout=0.0)
    B, T, C, H = 2, 8, 32, 16

    key = jax.random.PRNGKey(0)
    kx, kq, kk, kv = jax.random.split(key, 4)

    x = jax.random.normal(kx, (B, T, C), dtype=jnp.float32)
    # init matching nn.Linear's uniform(-1/sqrt(C), 1/sqrt(C)) scale
    bound = 1.0 / (C ** 0.5)
    wq = jax.random.uniform(kq, (C, H), jnp.float32, -bound, bound)
    wk = jax.random.uniform(kk, (C, H), jnp.float32, -bound, bound)
    wv = jax.random.uniform(kv, (C, H), jnp.float32, -bound, bound)

    out = head_forward(x, wq, wk, wv)
    jax.block_until_ready(out)

    ref = reference_head(x, wq, wk, wv)
    assert out.shape == (B, T, H)
    # Kernel uses bf16 MXU inputs (f32 accumulate/softmax) -> compare with a
    # tolerance that covers bf16 rounding of the projections / p@v.
    assert jnp.allclose(out, ref, atol=3e-2, rtol=3e-2), float(
        jnp.max(jnp.abs(out - ref)))

    print("KERNEL_OK")
</pallas_src>

<mosaic_0001>
module attributes {stable_mosaic.version = 11 : i64} {
  func.func @head_kernel(%arg0: i32, %arg1: memref<2x8x32xf32, #tpu.memory_space<vmem>>, %arg2: memref<32x48xf32, #tpu.memory_space<vmem>>, %arg3: memref<16x16xf32, #tpu.memory_space<vmem>>) attributes {dimension_semantics = [#tpu.dimension_semantics<parallel>], iteration_bounds = array<i64: 1>, scalar_prefetch = 0 : i64, scratch_operands = 0 : i64, tpu.core_type = #tpu.core_type<tc>, window_params = [{transform_indices = @transform_0, window_bounds = array<i64: 2, 8, 32>}, {pipeline_mode = #tpu.pipeline_mode<synchronous>, transform_indices = @transform_1, window_bounds = array<i64: 32, 48>}, {transform_indices = @transform_2, window_bounds = array<i64: 16, 16>}]} {
    %c0 = arith.constant 0 : index
    %c0_0 = arith.constant 0 : index
    %c0_1 = arith.constant 0 : index
    %0 = vector.load %arg1[%c0, %c0_0, %c0_1] : memref<2x8x32xf32, #tpu.memory_space<vmem>>, vector<2x8x32xf32>
    %1 = vector.shape_cast %0 : vector<2x8x32xf32> to vector<16x32xf32>
    %2 = arith.truncf %1 : vector<16x32xf32> to vector<16x32xbf16>
    %c0_2 = arith.constant 0 : index
    %c0_3 = arith.constant 0 : index
    %3 = vector.load %arg2[%c0_2, %c0_3] : memref<32x48xf32, #tpu.memory_space<vmem>>, vector<32x48xf32>
    %4 = arith.truncf %3 : vector<32x48xf32> to vector<32x48xbf16>
    %cst = arith.constant dense<0.000000e+00> : vector<16x48xf32>
    %5 = tpu.matmul %2, %4, %cst {dimension_numbers = #tpu.dot_dimension_numbers<[1], [0], [0], [1], [0, 0, 1, 1], [], []>} : vector<16x32xbf16>, vector<32x48xbf16>, vector<16x48xf32> -> vector<16x48xf32>
    %6 = vector.shape_cast %5 : vector<16x48xf32> to vector<2x8x48xf32>
    %7 = vector.extract_strided_slice %6 {offsets = [0, 0, 0], sizes = [2, 8, 16], strides = [1, 1, 1]} : vector<2x8x48xf32> to vector<2x8x16xf32>
    %8 = vector.extract_strided_slice %6 {offsets = [0, 0, 16], sizes = [2, 8, 16], strides = [1, 1, 1]} : vector<2x8x48xf32> to vector<2x8x16xf32>
    %9 = vector.extract_strided_slice %6 {offsets = [0, 0, 32], sizes = [2, 8, 16], strides = [1, 1, 1]} : vector<2x8x48xf32> to vector<2x8x16xf32>
    "tpu.trace_start"() <{level = 10 : i32, message = "bqh,bkh->bqk"}> : () -> ()
    %cst_4 = arith.constant dense<0.000000e+00> : vector<2x8x8xf32>
    %10 = tpu.matmul %7, %8, %cst_4 {dimension_numbers = #tpu.dot_dimension_numbers<[2], [2], [1], [1], [0, 0, 0, 1, 1, 1], [0], [0]>} : vector<2x8x16xf32>, vector<2x8x16xf32>, vector<2x8x8xf32> -> vector<2x8x8xf32>
    "tpu.trace_stop"() : () -> ()
    %cst_5 = arith.constant 0.176776692 : f32
    %11 = vector.broadcast %cst_5 : f32 to vector<2x8x8xf32>
    %12 = arith.mulf %10, %11 : vector<2x8x8xf32>
    %13 = tpu.iota {dimensions = array<i32: 1>} : vector<2x8x8xi32>
    %14 = tpu.iota {dimensions = array<i32: 2>} : vector<2x8x8xi32>
    %15 = arith.cmpi sle, %14, %13 : vector<2x8x8xi32>
    %cst_6 = arith.constant 0xFF800000 : f32
    %16 = vector.broadcast %cst_6 : f32 to vector<2x8x8xf32>
    %17 = arith.select %15, %12, %16 : vector<2x8x8xi1>, vector<2x8x8xf32>
    %cst_7 = arith.constant dense<0xFF800000> : vector<2x8xf32>
    %18 = vector.multi_reduction <maximumf>, %17, %cst_7 [2] : vector<2x8x8xf32> to vector<2x8xf32>
    %19 = vector.shape_cast %18 : vector<2x8xf32> to vector<2x8x1xf32>
    %20 = vector.broadcast %19 : vector<2x8x1xf32> to vector<2x8x8xf32>
    %21 = arith.subf %17, %20 : vector<2x8x8xf32>
    %22 = math.exp %21 : vector<2x8x8xf32>
    %cst_8 = arith.constant dense<0.000000e+00> : vector<2x8xf32>
    %23 = vector.multi_reduction <add>, %22, %cst_8 [2] : vector<2x8x8xf32> to vector<2x8xf32>
    %24 = vector.shape_cast %23 : vector<2x8xf32> to vector<2x8x1xf32>
    %25 = tpu.reciprocal %24 {approx = true} : vector<2x8x1xf32> -> vector<2x8x1xf32>
    %26 = vector.broadcast %25 : vector<2x8x1xf32> to vector<2x8x8xf32>
    %27 = arith.mulf %22, %26 : vector<2x8x8xf32>
    %28 = arith.truncf %27 : vector<2x8x8xf32> to vector<2x8x8xbf16>
    %29 = arith.truncf %9 : vector<2x8x16xf32> to vector<2x8x16xbf16>
    "tpu.trace_start"() <{level = 10 : i32, message = "bqk,bkh->bqh"}> : () -> ()
    %cst_9 = arith.constant dense<0.000000e+00> : vector<2x8x16xf32>
    %30 = tpu.matmul %28, %29, %cst_9 {dimension_numbers = #tpu.dot_dimension_numbers<[2], [1], [1], [2], [0, 0, 0, 1, 1, 2], [0], [0]>} : vector<2x8x8xbf16>, vector<2x8x16xbf16>, vector<2x8x16xf32> -> vector<2x8x16xf32>
    "tpu.trace_stop"() : () -> ()
    %31 = vector.shape_cast %30 : vector<2x8x16xf32> to vector<16x16xf32>
    %c0_10 = arith.constant 0 : index
    %c0_11 = arith.constant 0 : index
    %32 = vector.load %arg3[%c0_10, %c0_11] : memref<16x16xf32, #tpu.memory_space<vmem>>, vector<16x16xf32>
    tpu.vector_store %arg3[%c0_10, %c0_11], %31 {strides = array<i32>} : memref<16x16xf32, #tpu.memory_space<vmem>>, vector<16x16xf32>,
    return
  }
  func.func @transform_0(%arg0: i32) -> (i32, i32, i32) {
    %c0_i32 = arith.constant 0 : i32
    %c0_i32_0 = arith.constant 0 : i32
    %c0_i32_1 = arith.constant 0 : i32
    return %arg0, %c0_i32, %c0_i32_0 : i32, i32, i32
  }
  func.func @transform_1(%arg0: i32) -> (i32, i32) {
    %c0_i32 = arith.constant 0 : i32
    %c0_i32_0 = arith.constant 0 : i32
    %c0_i32_1 = arith.constant 0 : i32
    return %c0_i32, %c0_i32_0 : i32, i32
  }
  func.func @transform_2(%arg0: i32) -> (i32, i32) {
    %c0_i32 = arith.constant 0 : i32
    %c0_i32_0 = arith.constant 0 : i32
    return %arg0, %c0_i32 : i32, i32
  }
}

</mosaic_0001>

<bundles_post_ra>
// kernel: tpu_custom_call.1
= control target key start
LH: loop header
LB: loop body
LE: loop exit
PB: predicated region body
PF: predicated region fallthrough
CT: control target
= control target key end

     0   :  { %7 = vsyncpa [#allocation3], 0  ;;  %s630_s0 = inlined_call_operand.hbm [shape: f32[2,8,32], index: 0, kind: input, shape index: {}]   ;;  %s631_s1 = inlined_call_operand.hbm [shape: f32[32,48], index: 1, kind: input, shape index: {}]   ;;  %s632_s2 = inlined_call_operand.hbm [shape: f32[16,16], index: 2, kind: output, shape index: {}]  }
   0x1   :  { %8 = vsyncpa [#allocation6], 0 }
   0x2   :  { %9 = vsyncpa [#allocation4], 0  ;;  %s542_s9 = smov [#allocation2]   ;;  %s470_s13 = scalar_lea.hbm %s630_s0, 256 }
   0x3   :  { %s15_s10 = sshll.u32 %s542_s9, 4  ;;  %p471_p0 = scmp.ne.s32.totalorder %s630_s0, %s470_s13  ;;  %s16_s10 = int_to_ptr.vmem [resolvable:$true] %s15_s10 }
   0x4   :  { %p474_p1 = scmp.lt.u32.totalorder %s470_s13, %s630_s0 }
   0x6   :  { %p476_p2 = pnand %p474_p1, %p471_p0 }
   0x8   :  { %479 = shalt.err (!%p476_p2)
}
   0x9   :  { %s480_s18 = scalar_lea.vmem %s16_s10, 256  ;;  %p485_p4 = scmp.lt.s32.totalorder %s16_s10, %s16_s10 }
   0xa   :  { %p481_p3 = scmp.ne.s32.totalorder %s16_s10, %s480_s18  ;;  %p486_p5 = scmp.lt.s32.totalorder %s480_s18, %s480_s18 }
   0xc   :  { %p487_p6 = por %p486_p5, %p485_p4 }
   0xe   :  { %p488_p7 = pnand %p487_p6, %p481_p3 }
  0x10   :  { %491 = shalt.err (!%p488_p7)
}
  0x11   :  { %s543_s19 = smov 128   ;;  %s544_s20 = smov 8  }
  0x12   :  { %21 = dma.hbm_to_vmem [thread:$0]  %s630_s0, 256, %s16_s10, [#allocation3], %s543_s19, %s543_s19, %s544_s20  }
  0x13   :  { %s545_s23 = smov [#allocation5]   ;;  %s492_s27 = scalar_lea.hbm %s631_s1, 512 }
  0x14   :  { %s27_s24 = sshll.u32 %s545_s23, 4  ;;  %p493_p8 = scmp.ne.s32.totalorder %s631_s1, %s492_s27  ;;  %s28_s24 = int_to_ptr.vmem [resolvable:$true] %s27_s24 }
  0x15   :  { %p496_p9 = scmp.lt.u32.totalorder %s492_s27, %s631_s1 }
  0x17   :  { %p498_p10 = pnand %p496_p9, %p493_p8 }
  0x19   :  { %501 = shalt.err (!%p498_p10)
}
  0x1a   :  { %s502_s4 = scalar_lea.vmem %s28_s24, 512  ;;  %p507_p12 = scmp.lt.s32.totalorder %s28_s24, %s28_s24 }
  0x1b   :  { %p503_p11 = scmp.ne.s32.totalorder %s28_s24, %s502_s4  ;;  %p508_p13 = scmp.lt.s32.totalorder %s502_s4, %s502_s4 }
  0x1d   :  { %p509_p0 = por %p508_p13, %p507_p12 }
  0x1f   :  { %p510_p1 = pnand %p509_p0, %p503_p11 }
  0x21   :  { %513 = shalt.err (!%p510_p1)
}
  0x22   :  { %33 = dma.hbm_to_vmem [thread:$0]  %s631_s1, 512, %s28_s24, [#allocation6], %s543_s19, %s543_s19, %s544_s20  }
  0x23   :  { %536 = dma.done.wait [#allocation3], 256  }
  0x24   :  { %537 = vsyncadd [#allocation3], 4294967040 }
  0x25   :  { %538 = dma.done.wait [#allocation6], 512  }
  0x26   :  { %539 = vsyncadd [#allocation6], 4294966784  ;;  %v546_v0 = vmov 0.0   ;;  %vm547_vm0 = vmmov 0   ;;  %v44_v1 = vld [vmem:[#allocation5] sm:$0xff]  ;;  %v45_v2 = vld [vmem:[#allocation5 + $0x8] sm:$0xff]  ;;  %v252_v16 = vlaneseq }
  0x27   :  { %423 = vmatprep.subr.bf16.mxu0 %v546_v0  ;;  %427 = vmatprep.mubr.msk.bf16.mxu0 %vm547_vm0, %v546_v0  ;;  %v46_v3 = vld [vmem:[#allocation5 + $0x10] sm:$0xff]  ;;  %v48_v4 = vpack.c.bf16 %v45_v2, %v44_v1  ;;  %v47_v5 = vld [vmem:[#allocation5 + $0x18] sm:$0xff]  ;;  %vm50_vm1 = vcmask 261120   ;;  %s548_s1 = smov 112   ;;  %vm98_vm2 = vcmask 130048   ;;  %vm259_vm4 = vcmask 64512  }
  0x28   :  { %431 = vmatprep.subr.mxu1 %v546_v0  ;;  %433 = vmatprep.mubr.msk.f32.mxu1 %vm547_vm0, %v546_v0  ;;  %v49_v6 = vpack.c.bf16 %v47_v5, %v46_v3  ;;  %v41_v7 = vld [vmem:[#allocation2] sm:$0xff]  ;;  %v42_v8 = vld [vmem:[#allocation2 + $0x8] sm:$0xff]  ;;  %v253_v17 = vshrl.u32 %v252_v16, 7  ;;  %v255_v18 = vand.u32 127, %v252_v16  ;;  %s549_s6 = smov 96   ;;  %vm292_vm5 = vcmask 1043456  }
  0x29   :  { %424 = vmatpush3.bf16.msra.mxu0 %v48_v4  ;;  %v43_v9 = vpack.c.bf16 %v42_v8, %v41_v7  ;;  %s550_s7 = smov [#allocation7]  }
  0x2a   :  { %425 = vmatprep.subr.bf16.mxu0 %v546_v0  ;;  %vm256_vm3 = vcmp.le.s32.totalorder %v255_v18, %v253_v17  ;;  %s392_s8 = sshll.u32 %s550_s7, 4  ;;  %s393_s8 = int_to_ptr.vmem [resolvable:$true] %s392_s8 }
  0x2b   :  { %s514_s9 = scalar_lea.vmem %s393_s8, 256  ;;  %p519_p3 = scmp.lt.s32.totalorder %s393_s8, %s393_s8 }
  0x2c   :  { %p515_p2 = scmp.ne.s32.totalorder %s393_s8, %s514_s9  ;;  %p520_p4 = scmp.lt.s32.totalorder %s514_s9, %s514_s9 }
  0x2d   :  { %426 = vmatpush3.bf16.msra.mxu0 %v49_v6 }
  0x2e   :  { %447 = vmatprep.subr.bf16.mxu0 %v546_v0  ;;  %p521_p5 = por %p520_p4, %p519_p3 }
  0x30   :  { %428 = vmatmul.mubr.msk.bf16.vlgmr.msra.gmra.mrb[0].mxu0 %vm50_vm1, %v43_v9  ;;  %p522_p6 = pnand %p521_p5, %p515_p2 }
  0x31   :  { %449 = vmatprep.mubr.msk.bf16.mxu0 %vm547_vm0, %v546_v0 }
 0x103   :  { %v88_v10 = vpop.f32.mrb[0].mxu0 }
 0x104   :  { %96 = vrot.lane.b32.xlu0 %v88_v10, %s548_s1  ;;  %v429_v11 = vpop.f32.mrb[1].mxu0  ;;  %v284_v29 = vpack.c.bf16 %v88_v10, %v88_v10 }
 0x105   :  { %v91_v12 = vpop.f32.mrb[2].mxu0 }
 0x106   :  { %v430_v13 = vpop.f32.mrb[3].mxu0  ;;  %v285_v42 = vpack.c.bf16 %v91_v12, %v91_v12 }
 0x108   :  { %174 = vrot.lane.b32.xlu0 %v91_v12, %s548_s1 }
 0x176   :  { %v97_v14 = vpop.permute.xlu0 %96 }
 0x177   :  { %432 = vmatpush3.xpose.msk.msra.mxu1 %vm98_vm2, %v97_v14 }
 0x178   :  { %436 = vmatprep.subr.mxu1 %v546_v0 }
 0x17a   :  { %434 = vmatmul.mubr.msk.f32.vlgmr.msra.gmra.mrb[0].mxu1 %vm98_vm2, %v88_v10  ;;  %v175_v15 = vpop.permute.xlu0 %174 }
 0x17b   :  { %437 = vmatpush3.xpose.msk.msra.mxu1 %vm98_vm2, %v175_v15  ;;  %438 = vmatprep.mubr.msk.f32.mxu1 %vm547_vm0, %v546_v0 }
 0x17c   :  { %441 = vmatprep.subr.bf16.mxu1 %v546_v0 }
 0x17e   :  { %439 = vmatmul.mubr.msk.f32.vlgmr.msra.gmra.mrb[2].mxu1 %vm98_vm2, %v91_v12 }
 0x17f   :  { %443 = vmatprep.mubr.msk.bf16.mxu1 %vm547_vm0, %v546_v0 }
 0x24d   :  { %v169_v19 = vpop.f32.mrb[0].mxu1 }
 0x24e   :  { %v250_v20 = vmul.f32 0.17677669, %v169_v19  ;;  %v435_v21 = vpop.f32.mrb[1].mxu1 }
 0x250   :  { %v257_v22 = vsel %vm256_vm3, %v250_v20, -inf }
 0x251   :  { %v246_v23 = vpop.f32.mrb[2].mxu1  ;;  %v260_v24 = vsel %vm259_vm4, %v257_v22, -inf }
 0x252   :  { %v251_v25 = vmul.f32 0.17677669, %v246_v23  ;;  %261 = vmax.xlane.f32.xlu1 %v260_v24  ;;  %v440_v26 = vpop.f32.mrb[3].mxu1 }
 0x254   :  { %v258_v27 = vsel %vm256_vm3, %v251_v25, -inf }
 0x255   :  { %v263_v28 = vsel %vm259_vm4, %v258_v27, -inf }
 0x256   :  { %264 = vmax.xlane.f32.xlu1 %v263_v28 }
 0x267   :  { %287 = vrot.lane.b32.xlu1 %v284_v29, %s549_s6 }
 0x2df   :  { %v262_v30 = vpop.xlane.xlu1 %261 }
 0x2e0   :  { %v266_v31 = vsub.f32 %v257_v22, %v262_v30 }
 0x2e2   :  { %v268_v32 = vmul.f32 1.442695, %v266_v31 }
 0x2e3   :  { %v265_v33 = vpop.xlane.xlu1 %264 }
 0x2e4   :  { %462 = vpow2.f32 %v268_v32  ;;  %v267_v34 = vsub.f32 %v258_v27, %v265_v33 }
 0x2e6   :  { %v270_v35 = vmul.f32 1.442695, %v267_v34 }
 0x2e7   :  { %v288_v36 = vpop.permute.xlu1 %287 }
 0x2e8   :  { %464 = vpow2.f32 %v270_v35  ;;  %v294_v37 = vsel %vm292_vm5, %v288_v36, 0 }
 0x2e9   :  { %442 = vmatpush3.bf16.msra.mxu1 %v294_v37 }
 0x2ee   :  { %v463_v38 = vpop.eup %462 }
 0x2ef   :  { %v272_v39 = vsel %vm259_vm4, %v463_v38, 0.0 }
 0x2f0   :  { %273 = vadd.xlane.f32.xlu0 %v272_v39 }
 0x2f2   :  { %v465_v40 = vpop.eup %464 }
 0x2f3   :  { %v275_v41 = vsel %vm259_vm4, %v465_v40, 0.0 }
 0x2f4   :  { %276 = vadd.xlane.f32.xlu1 %v275_v41 }
 0x305   :  { %337 = vrot.lane.b32.xlu1 %v285_v42, %s549_s6 }
 0x37d   :  { %v274_v43 = vpop.xlane.xlu0 %273 }
 0x37e   :  { %466 = vrcp.f32 %v274_v43 }
 0x381   :  { %v277_v44 = vpop.xlane.xlu1 %276 }
 0x382   :  { %468 = vrcp.f32 %v277_v44 }
 0x385   :  { %v338_v45 = vpop.permute.xlu1 %337 }
 0x386   :  { %v343_v46 = vsel %vm292_vm5, %v338_v45, 0 }
 0x387   :  { %448 = vmatpush3.bf16.msra.mxu0 %v343_v46 }
 0x388   :  { %v467_v47 = vpop.eup %466 }
 0x389   :  { %v280_v48 = vmul.f32 %v467_v47, %v463_v38 }
 0x38b   :  { %v282_v49 = vpack.c.bf16 %v280_v48, %v280_v48 }
 0x38c   :  { %v469_v50 = vpop.eup %468 }
 0x38d   :  { %v281_v51 = vmul.f32 %v469_v50, %v465_v40  ;;  %444 = vmatmul.mubr.msk.bf16.vlgmr.msra.gmra.mrb[4].mxu1 %vm259_vm4, %v282_v49 }
 0x38f   :  { %v283_v52 = vpack.c.bf16 %v281_v51, %v281_v51 }
 0x391   :  { %450 = vmatmul.mubr.msk.bf16.vlgmr.msra.gmra.mrb[4].mxu0 %vm259_vm4, %v283_v52 }
 0x460   :  { %v330_v53 = vpop.f32.mrb[4].mxu1 }
 0x461   :  { %385 = vst.msk [vmem:[#allocation7] sm:$0xff] %vm98_vm2, %v330_v53  ;;  %v445_v54 = vpop.f32.mrb[5].mxu1 }
 0x462   :  { %v333_v55 = vpop.f32.mrb[6].mxu1 }
 0x463   :  { %v446_v56 = vpop.f32.mrb[7].mxu1 }
 0x464   :  { %v379_v57 = vpop.f32.mrb[4].mxu0 }
 0x465   :  { %386 = vst.msk [vmem:[#allocation7 + $0x8] sm:$0xff] %vm98_vm2, %v379_v57  ;;  %v451_v58 = vpop.f32.mrb[5].mxu0 }
 0x466   :  { %v382_v59 = vpop.f32.mrb[6].mxu0 }
 0x467   :  { %525 = shalt.err (!%p522_p6)
}
 0x468   :  { %s526_s12 = scalar_lea.hbm %s632_s2, 256 }
 0x469   :  { %p527_p7 = scmp.ne.s32.totalorder %s632_s2, %s526_s12  ;;  %p530_p8 = scmp.lt.u32.totalorder %s526_s12, %s632_s2 }
 0x46b   :  { %p532_p9 = pnand %p530_p8, %p527_p7 }
 0x46d   :  { %535 = shalt.err (!%p532_p9)
}
 0x46e   :  { %398 = dma.vmem_to_hbm [thread:$0]  %s393_s8, 256, %s632_s2, [#allocation4], %s543_s19, %s543_s19, %s544_s20   ;;  %v452_v60 = vpop.f32.mrb[7].mxu0 }
 0x46f   :  { %540 = dma.done.wait [#allocation4], 256  }
 0x470   :  { %541 = vsyncadd [#allocation4], 4294967040 }
 0x471   :  { %402 = vsyncpa [#allocation3], 1 }
 0x472   :  { %403 = vsyncpa [#allocation6], 1 }
 0x473   :  { %404 = vsyncpa [#allocation4], 1 }

</bundles_post_ra>
